<compile_context>
chip_gen: v7x
topology: tpu7x:2x2x1
jax: 0.10.0
libtpu: 0.0.40
codegen_flags: <defaults>
</compile_context>

<pallas_src>
import functools

import jax
import jax.numpy as jnp
from jax import lax
from jax.experimental import pallas as pl
from jax.experimental.pallas import tpu as pltpu

LANES = 128          # padded hidden width (lane-dense resident weights)
OUT_LANES = 8        # padded output width (narrow slab -> 16x less HBM writeback)
IN_FEATURES = 4
H1, H2, OUT = 24, 48, 2


def _cdiv(a, b):
    return (a + b - 1) // b


def _round_up(n, m):
    return ((n + m - 1) // m) * m


def dqn_kernel(x_ref, w1_ref, b1_ref, w2_ref, b2_ref, w3_ref, b3_ref, o_ref):
    # x_ref: (TB, 4)        w1_ref: (4, 128)    b1_ref: (1, 128)
    # w2_ref: (128, 128)    b2_ref: (1, 128)
    # w3_ref: (128, 128)    b3_ref: (1, 8)      o_ref: (TB, 8)
    x = x_ref[...]
    w1 = w1_ref[...]

    # ---- layer 1: K=4 contraction as VPU broadcast-FMAs (skip the MXU) ----
    acc = b1_ref[...] + x[:, 0:1] * w1[0:1, :]
    for k in range(1, IN_FEATURES):           # static unroll, 3 more FMAs
        acc = acc + x[:, k : k + 1] * w1[k : k + 1, :]
    h1 = jnp.tanh(acc)                        # (TB, 128); padded cols stay 0

    # ---- layer 2: MXU matmul, explicit f32-parity precision ----
    h2 = jnp.tanh(
        jnp.dot(h1, w2_ref[...], preferred_element_type=jnp.float32,
                precision=lax.Precision.HIGHEST)
        + b2_ref[...]
    )

    # ---- layer 3 (output head): MXU matmul against resident w3, then store only
    # the first OUT_LANES lanes (narrow, low-writeback output slab) ----
    out = jnp.dot(h2, w3_ref[...], preferred_element_type=jnp.float32,
                  precision=lax.Precision.HIGHEST)
    o_ref[...] = (out[:, :OUT_LANES] + b3_ref[...]).astype(o_ref.dtype)


def prepare_params(params):
    """Zero-pad logical PyTorch-shaped params once, host-side, to TPU-friendly
    lane-dense layouts.  Padded rows/cols are zero so they contribute nothing."""
    w1, b1, w2, b2, w3, b3 = params
    w1p = jnp.zeros((IN_FEATURES, LANES), jnp.float32).at[:, :H1].set(w1)
    b1p = jnp.zeros((1, LANES), jnp.float32).at[:, :H1].set(b1)
    w2p = jnp.zeros((LANES, LANES), jnp.float32).at[:H1, :H2].set(w2)
    b2p = jnp.zeros((1, LANES), jnp.float32).at[:, :H2].set(b2)
    w3p = jnp.zeros((LANES, LANES), jnp.float32).at[:H2, :OUT].set(w3)
    b3p = jnp.zeros((1, OUT_LANES), jnp.float32).at[:, :OUT].set(b3)
    return (w1p, b1p, w2p, b2p, w3p, b3p)


@functools.partial(jax.jit, static_argnames=("tb",))
def dqn_forward(x, padded_params, tb=1024):
    """x: (B, 4) f32.  padded_params: output of prepare_params.  Returns (B, 2)."""
    w1, b1, w2, b2, w3, b3 = padded_params
    B = x.shape[0]

    # Ragged-tail-aware tiling: choose the number of tiles first, then the
    # smallest multiple-of-8 tile that covers B (<=7 padded rows per tile).
    n = _cdiv(B, tb)
    if n > 1:
        n = _round_up(n, 2)      # feed both v7x TensorCores; harmless on 1-TC chips
    TB = _round_up(_cdiv(B, n), 8)
    Bp = n * TB
    if Bp != B:
        x = jnp.pad(x, ((0, Bp - B), (0, 0)))   # extra rows are sliced off below

    const = lambda shape: pl.BlockSpec(shape, lambda i: (0, 0))
    out_padded = pl.pallas_call(
        dqn_kernel,
        out_shape=jax.ShapeDtypeStruct((Bp, OUT_LANES), jnp.float32),
        grid=(n,),
        in_specs=[
            pl.BlockSpec((TB, IN_FEATURES), lambda i: (i, 0)),   # x: batch-tiled
            const((IN_FEATURES, LANES)),                         # w1 (resident)
            const((1, LANES)),                                   # b1
            const((LANES, LANES)),                               # w2
            const((1, LANES)),                                   # b2
            const((LANES, LANES)),                               # w3
            const((1, OUT_LANES)),                               # b3
        ],
        out_specs=pl.BlockSpec((TB, OUT_LANES), lambda i: (i, 0)),  # narrow out
        compiler_params=pltpu.CompilerParams(
            dimension_semantics=("parallel",),                   # v7x: 2 TCs
        ),
        cost_estimate=pl.CostEstimate(
            # Padded (actually executed / moved) work, per review.
            flops=2 * Bp * (IN_FEATURES * LANES + LANES * LANES + LANES * LANES),
            transcendentals=Bp * (H1 + H2),
            bytes_accessed=4 * (Bp * IN_FEATURES + Bp * OUT_LANES
                                + IN_FEATURES * LANES + 2 * LANES * LANES
                                + 2 * LANES + OUT_LANES),
        ),
    )(x, w1, b1, w2, b2, w3, b3)

    # TODO(synk): if the consumer is argmax/gather over actions, fuse it into the
    # kernel (XLU lane reduce) and return (B,) instead of slicing here.
    return out_padded[:B, :OUT]


def init_params(key):
    # Match PyTorch nn.Linear default init: U(-1/sqrt(fan_in), 1/sqrt(fan_in)).
    def linear(key, fan_in, fan_out):
        kw, kb = jax.random.split(key)
        bound = 1.0 / jnp.sqrt(fan_in)
        w = jax.random.uniform(kw, (fan_in, fan_out), jnp.float32, -bound, bound)
        b = jax.random.uniform(kb, (1, fan_out), jnp.float32, -bound, bound)
        return w, b

    k1, k2, k3 = jax.random.split(key, 3)
    w1, b1 = linear(k1, IN_FEATURES, H1)
    w2, b2 = linear(k2, H1, H2)
    w3, b3 = linear(k3, H2, OUT)
    return (w1, b1, w2, b2, w3, b3)


def reference_forward(x, params):
    w1, b1, w2, b2, w3, b3 = params
    hp = lax.Precision.HIGHEST
    h1 = jnp.tanh(jnp.dot(x, w1, precision=hp) + b1)
    h2 = jnp.tanh(jnp.dot(h1, w2, precision=hp) + b2)
    return jnp.dot(h2, w3, precision=hp) + b3


if __name__ == "__main__":
    key = jax.random.PRNGKey(0)
    kx, kx2, kp = jax.random.split(key, 3)

    params = init_params(kp)
    padded = prepare_params(params)

    # Small per-env-step microbatch (TB=8, grid=(1,)).
    B = 8
    x = jax.random.normal(kx, (B, IN_FEATURES), jnp.float32)
    out = jax.block_until_ready(dqn_forward(x, padded))
    ref = reference_forward(x, params)
    assert out.shape == (B, OUT), out.shape
    assert jnp.allclose(out, ref, atol=1e-5, rtol=1e-5)

    # Replay-style batch, single large tile: B=300 -> TB=304, Bp=304 (<=7 pad rows).
    B2 = 300
    x2 = jax.random.normal(kx2, (B2, IN_FEATURES), jnp.float32)
    out2 = jax.block_until_ready(dqn_forward(x2, padded))
    ref2 = reference_forward(x2, params)
    assert out2.shape == (B2, OUT), out2.shape
    assert jnp.allclose(out2, ref2, atol=1e-5, rtol=1e-5)

    # Same batch with a small tile budget: exercises the multi-tile batch grid
    # (n rounded to 4, TB=80, grid=(4,)) and the even-grid v7x path.
    out3 = jax.block_until_ready(dqn_forward(x2, padded, tb=128))
    assert out3.shape == (B2, OUT), out3.shape
    assert jnp.allclose(out3, ref2, atol=1e-5, rtol=1e-5)

    print("KERNEL_OK")
</pallas_src>

<mosaic_0001>
module attributes {stable_mosaic.version = 11 : i64} {
  func.func @dqn_kernel(%arg0: i32, %arg1: memref<8x4xf32, #tpu.memory_space<vmem>>, %arg2: memref<4x128xf32, #tpu.memory_space<vmem>>, %arg3: memref<1x128xf32, #tpu.memory_space<vmem>>, %arg4: memref<128x128xf32, #tpu.memory_space<vmem>>, %arg5: memref<1x128xf32, #tpu.memory_space<vmem>>, %arg6: memref<128x128xf32, #tpu.memory_space<vmem>>, %arg7: memref<1x8xf32, #tpu.memory_space<vmem>>, %arg8: memref<8x8xf32, #tpu.memory_space<vmem>>) attributes {dimension_semantics = [#tpu.dimension_semantics<parallel>], iteration_bounds = array<i64: 1>, scalar_prefetch = 0 : i64, scratch_operands = 0 : i64, tpu.core_type = #tpu.core_type<tc>, window_params = [{transform_indices = @transform_0, window_bounds = array<i64: 8, 4>}, {pipeline_mode = #tpu.pipeline_mode<synchronous>, transform_indices = @transform_1, window_bounds = array<i64: 4, 128>}, {pipeline_mode = #tpu.pipeline_mode<synchronous>, transform_indices = @transform_2, window_bounds = array<i64: 1, 128>}, {pipeline_mode = #tpu.pipeline_mode<synchronous>, transform_indices = @transform_3, window_bounds = array<i64: 128, 128>}, {pipeline_mode = #tpu.pipeline_mode<synchronous>, transform_indices = @transform_4, window_bounds = array<i64: 1, 128>}, {pipeline_mode = #tpu.pipeline_mode<synchronous>, transform_indices = @transform_5, window_bounds = array<i64: 128, 128>}, {pipeline_mode = #tpu.pipeline_mode<synchronous>, transform_indices = @transform_6, window_bounds = array<i64: 1, 8>}, {transform_indices = @transform_7, window_bounds = array<i64: 8, 8>}]} {
    %c0 = arith.constant 0 : index
    %c0_0 = arith.constant 0 : index
    %0 = vector.load %arg1[%c0, %c0_0] : memref<8x4xf32, #tpu.memory_space<vmem>>, vector<8x4xf32>
    %c0_1 = arith.constant 0 : index
    %c0_2 = arith.constant 0 : index
    %1 = vector.load %arg2[%c0_1, %c0_2] : memref<4x128xf32, #tpu.memory_space<vmem>>, vector<4x128xf32>
    %c0_3 = arith.constant 0 : index
    %c0_4 = arith.constant 0 : index
    %2 = vector.load %arg3[%c0_3, %c0_4] : memref<1x128xf32, #tpu.memory_space<vmem>>, vector<1x128xf32>
    %3 = vector.extract_strided_slice %0 {offsets = [0, 0], sizes = [8, 1], strides = [1, 1]} : vector<8x4xf32> to vector<8x1xf32>
    %4 = vector.extract_strided_slice %1 {offsets = [0, 0], sizes = [1, 128], strides = [1, 1]} : vector<4x128xf32> to vector<1x128xf32>
    %5 = vector.broadcast %3 : vector<8x1xf32> to vector<8x128xf32>
    %6 = vector.broadcast %4 : vector<1x128xf32> to vector<8x128xf32>
    %7 = arith.mulf %5, %6 : vector<8x128xf32>
    %8 = vector.broadcast %2 : vector<1x128xf32> to vector<8x128xf32>
    %9 = arith.addf %8, %7 : vector<8x128xf32>
    %10 = vector.extract_strided_slice %0 {offsets = [0, 1], sizes = [8, 1], strides = [1, 1]} : vector<8x4xf32> to vector<8x1xf32>
    %11 = vector.extract_strided_slice %1 {offsets = [1, 0], sizes = [1, 128], strides = [1, 1]} : vector<4x128xf32> to vector<1x128xf32>
    %12 = vector.broadcast %10 : vector<8x1xf32> to vector<8x128xf32>
    %13 = vector.broadcast %11 : vector<1x128xf32> to vector<8x128xf32>
    %14 = arith.mulf %12, %13 : vector<8x128xf32>
    %15 = arith.addf %9, %14 : vector<8x128xf32>
    %16 = vector.extract_strided_slice %0 {offsets = [0, 2], sizes = [8, 1], strides = [1, 1]} : vector<8x4xf32> to vector<8x1xf32>
    %17 = vector.extract_strided_slice %1 {offsets = [2, 0], sizes = [1, 128], strides = [1, 1]} : vector<4x128xf32> to vector<1x128xf32>
    %18 = vector.broadcast %16 : vector<8x1xf32> to vector<8x128xf32>
    %19 = vector.broadcast %17 : vector<1x128xf32> to vector<8x128xf32>
    %20 = arith.mulf %18, %19 : vector<8x128xf32>
    %21 = arith.addf %15, %20 : vector<8x128xf32>
    %22 = vector.extract_strided_slice %0 {offsets = [0, 3], sizes = [8, 1], strides = [1, 1]} : vector<8x4xf32> to vector<8x1xf32>
    %23 = vector.extract_strided_slice %1 {offsets = [3, 0], sizes = [1, 128], strides = [1, 1]} : vector<4x128xf32> to vector<1x128xf32>
    %24 = vector.broadcast %22 : vector<8x1xf32> to vector<8x128xf32>
    %25 = vector.broadcast %23 : vector<1x128xf32> to vector<8x128xf32>
    %26 = arith.mulf %24, %25 : vector<8x128xf32>
    %27 = arith.addf %21, %26 : vector<8x128xf32>
    %28 = math.tanh %27 : vector<8x128xf32>
    %c0_5 = arith.constant 0 : index
    %c0_6 = arith.constant 0 : index
    %29 = vector.load %arg4[%c0_5, %c0_6] : memref<128x128xf32, #tpu.memory_space<vmem>>, vector<128x128xf32>
    %cst = arith.constant dense<0.000000e+00> : vector<8x128xf32>
    %30 = tpu.matmul %28, %29, %cst {dimension_numbers = #tpu.dot_dimension_numbers<[1], [0], [0], [1], [0, 0, 1, 1], [], []>, precision = #tpu.contract_precision<fp32>} : vector<8x128xf32>, vector<128x128xf32>, vector<8x128xf32> -> vector<8x128xf32>
    %c0_7 = arith.constant 0 : index
    %c0_8 = arith.constant 0 : index
    %31 = vector.load %arg5[%c0_7, %c0_8] : memref<1x128xf32, #tpu.memory_space<vmem>>, vector<1x128xf32>
    %32 = vector.broadcast %31 : vector<1x128xf32> to vector<8x128xf32>
    %33 = arith.addf %30, %32 : vector<8x128xf32>
    %34 = math.tanh %33 : vector<8x128xf32>
    %c0_9 = arith.constant 0 : index
    %c0_10 = arith.constant 0 : index
    %35 = vector.load %arg6[%c0_9, %c0_10] : memref<128x128xf32, #tpu.memory_space<vmem>>, vector<128x128xf32>
    %cst_11 = arith.constant dense<0.000000e+00> : vector<8x128xf32>
    %36 = tpu.matmul %34, %35, %cst_11 {dimension_numbers = #tpu.dot_dimension_numbers<[1], [0], [0], [1], [0, 0, 1, 1], [], []>, precision = #tpu.contract_precision<fp32>} : vector<8x128xf32>, vector<128x128xf32>, vector<8x128xf32> -> vector<8x128xf32>
    %37 = vector.extract_strided_slice %36 {offsets = [0, 0], sizes = [8, 8], strides = [1, 1]} : vector<8x128xf32> to vector<8x8xf32>
    %c0_12 = arith.constant 0 : index
    %c0_13 = arith.constant 0 : index
    %38 = vector.load %arg7[%c0_12, %c0_13] : memref<1x8xf32, #tpu.memory_space<vmem>>, vector<1x8xf32>
    %39 = vector.broadcast %38 : vector<1x8xf32> to vector<8x8xf32>
    %40 = arith.addf %37, %39 : vector<8x8xf32>
    %c0_14 = arith.constant 0 : index
    %c0_15 = arith.constant 0 : index
    %41 = vector.load %arg8[%c0_14, %c0_15] : memref<8x8xf32, #tpu.memory_space<vmem>>, vector<8x8xf32>
    tpu.vector_store %arg8[%c0_14, %c0_15], %40 {strides = array<i32>} : memref<8x8xf32, #tpu.memory_space<vmem>>, vector<8x8xf32>,
    return
  }
  func.func @transform_0(%arg0: i32) -> (i32, i32) {
    %c0_i32 = arith.constant 0 : i32
    %c0_i32_0 = arith.constant 0 : i32
    return %arg0, %c0_i32 : i32, i32
  }
  func.func @transform_1(%arg0: i32) -> (i32, i32) {
    %c0_i32 = arith.constant 0 : i32
    %c0_i32_0 = arith.constant 0 : i32
    %c0_i32_1 = arith.constant 0 : i32
    return %c0_i32, %c0_i32_0 : i32, i32
  }
  func.func @transform_2(%arg0: i32) -> (i32, i32) {
    %c0_i32 = arith.constant 0 : i32
    %c0_i32_0 = arith.constant 0 : i32
    %c0_i32_1 = arith.constant 0 : i32
    return %c0_i32, %c0_i32_0 : i32, i32
  }
  func.func @transform_3(%arg0: i32) -> (i32, i32) {
    %c0_i32 = arith.constant 0 : i32
    %c0_i32_0 = arith.constant 0 : i32
    %c0_i32_1 = arith.constant 0 : i32
    return %c0_i32, %c0_i32_0 : i32, i32
  }
  func.func @transform_4(%arg0: i32) -> (i32, i32) {
    %c0_i32 = arith.constant 0 : i32
    %c0_i32_0 = arith.constant 0 : i32
    %c0_i32_1 = arith.constant 0 : i32
    return %c0_i32, %c0_i32_0 : i32, i32
  }
  func.func @transform_5(%arg0: i32) -> (i32, i32) {
    %c0_i32 = arith.constant 0 : i32
    %c0_i32_0 = arith.constant 0 : i32
    %c0_i32_1 = arith.constant 0 : i32
    return %c0_i32, %c0_i32_0 : i32, i32
  }
  func.func @transform_6(%arg0: i32) -> (i32, i32) {
    %c0_i32 = arith.constant 0 : i32
    %c0_i32_0 = arith.constant 0 : i32
    %c0_i32_1 = arith.constant 0 : i32
    return %c0_i32, %c0_i32_0 : i32, i32
  }
  func.func @transform_7(%arg0: i32) -> (i32, i32) {
    %c0_i32 = arith.constant 0 : i32
    %c0_i32_0 = arith.constant 0 : i32
    return %arg0, %c0_i32 : i32, i32
  }
}

</mosaic_0001>

<bundles_post_ra>
// kernel: dqn_forward.1
= control target key start
LH: loop header
LB: loop body
LE: loop exit
PB: predicated region body
PF: predicated region fallthrough
CT: control target
= control target key end

     0   :  { %12 = vsyncpa [#allocation3], 0  ;;  %s3084_s0 = inlined_call_operand.vmem [shape: f32[8,4], index: 0, kind: input, shape index: {}]   ;;  %s3085_s1 = inlined_call_operand.vmem [shape: f32[4,128], index: 1, kind: input, shape index: {}]   ;;  %s3086_s2 = inlined_call_operand.vmem [shape: f32[1,128], index: 2, kind: input, shape index: {}]   ;;  %s3087_s3 = inlined_call_operand.hbm [shape: f32[128,128], index: 3, kind: input, shape index: {}]   ;;  %s3088_s4 = inlined_call_operand.vmem [shape: f32[1,128], index: 4, kind: input, shape index: {}]   ;;  %s3089_s5 = inlined_call_operand.hbm [shape: f32[128,128], index: 5, kind: input, shape index: {}]   ;;  %s3090_s6 = inlined_call_operand.vmem [shape: f32[1,8], index: 6, kind: input, shape index: {}]   ;;  %s3091_s7 = inlined_call_operand.vmem [shape: f32[8,8], index: 7, kind: output, shape index: {}]  }
   0x1   :  { %13 = vsyncpa [#allocation5], 0  ;;  %s2437_s24 = smov [#allocation2]   ;;  %s2389_s28 = scalar_lea.hbm %s3087_s3, 2048 }
   0x2   :  { %s25_s25 = sshll.u32 %s2437_s24, 4  ;;  %p2390_p0 = scmp.ne.s32.totalorder %s3087_s3, %s2389_s28  ;;  %s26_s25 = int_to_ptr.vmem [resolvable:$true] %s25_s25 }
   0x3   :  { %p2393_p1 = scmp.lt.u32.totalorder %s2389_s28, %s3087_s3 }
   0x5   :  { %p2395_p2 = pnand %p2393_p1, %p2390_p0 }
   0x7   :  { %2398 = shalt.err (!%p2395_p2)
}
   0x8   :  { %s2399_s10 = scalar_lea.vmem %s26_s25, 2048  ;;  %p2404_p4 = scmp.lt.s32.totalorder %s26_s25, %s26_s25 }
   0x9   :  { %p2400_p3 = scmp.ne.s32.totalorder %s26_s25, %s2399_s10  ;;  %p2405_p5 = scmp.lt.s32.totalorder %s2399_s10, %s2399_s10 }
   0xb   :  { %p2406_p6 = por %p2405_p5, %p2404_p4 }
   0xd   :  { %p2407_p7 = pnand %p2406_p6, %p2400_p3 }
   0xf   :  { %2410 = shalt.err (!%p2407_p7)
}
  0x10   :  { %s2438_s11 = smov 128   ;;  %s2439_s12 = smov 8  }
  0x11   :  { %31 = dma.hbm_to_vmem [thread:$0]  %s3087_s3, 2048, %s26_s25, [#allocation3], %s2438_s11, %s2438_s11, %s2439_s12  }
  0x12   :  { %s2440_s15 = smov [#allocation4]   ;;  %s2411_s19 = scalar_lea.hbm %s3089_s5, 2048 }
  0x13   :  { %s39_s16 = sshll.u32 %s2440_s15, 4  ;;  %p2412_p8 = scmp.ne.s32.totalorder %s3089_s5, %s2411_s19  ;;  %s40_s16 = int_to_ptr.vmem [resolvable:$true] %s39_s16 }
  0x14   :  { %p2415_p9 = scmp.lt.u32.totalorder %s2411_s19, %s3089_s5 }
  0x16   :  { %p2417_p10 = pnand %p2415_p9, %p2412_p8 }
  0x18   :  { %2420 = shalt.err (!%p2417_p10)
}
  0x19   :  { %s2421_s24 = scalar_lea.vmem %s40_s16, 2048  ;;  %p2426_p12 = scmp.lt.s32.totalorder %s40_s16, %s40_s16 }
  0x1a   :  { %p2422_p11 = scmp.ne.s32.totalorder %s40_s16, %s2421_s24  ;;  %p2427_p13 = scmp.lt.s32.totalorder %s2421_s24, %s2421_s24 }
  0x1c   :  { %p2428_p0 = por %p2427_p13, %p2426_p12 }
  0x1e   :  { %p2429_p1 = pnand %p2428_p0, %p2422_p11 }
  0x20   :  { %2432 = shalt.err (!%p2429_p1)
}
  0x21   :  { %45 = dma.hbm_to_vmem [thread:$0]  %s3089_s5, 2048, %s40_s16, [#allocation5], %s2438_s11, %s2438_s11, %s2439_s12  }
  0x22   :  { %2433 = dma.done.wait [#allocation3], 2048  }
  0x23   :  { %2434 = vsyncadd [#allocation3], 4294965248 }
  0x24   :  { %2435 = dma.done.wait [#allocation5], 2048  }
  0x25   :  { %2436 = vsyncadd [#allocation5], 4294965248  ;;  %v2441_v0 = vmov 0   ;;  %v2442_v1 = vmov 2   ;;  %v54_v2 = vld [vmem:[%s3084_s0] sm:$0xff]  ;;  %v106_v4 = vld [vmem:[#allocation2 + $0x8] sm:$0xff] }
  0x26   :  { %2380 = vset.pattern.permute.xlu0 %v2441_v0  ;;  %2382 = vset.pattern.permute.xlu1 %v2442_v1  ;;  %v105_v3 = vld [vmem:[#allocation2] sm:$0xff]  ;;  %v2443_v5 = vmov 0.0|0.0   ;;  %v132_v7 = vand.u32 4294901760, %v106_v4  ;;  %v107_v8 = vld [vmem:[#allocation2 + $0x10] sm:$0xff]  ;;  %v108_v9 = vld [vmem:[#allocation2 + $0x18] sm:$0xff]  ;;  %v2444_v15 = vmov 1  }
  0x27   :  { %59 = vperm.xlu0 %2380, %v54_v2   ;;  %85 = vperm.xlu1 %2382, %v54_v2   ;;  %v129_v6 = vand.u32 4294901760, %v105_v3  ;;  %v135_v10 = vand.u32 4294901760, %v107_v8  ;;  %v138_v11 = vand.u32 4294901760, %v108_v9  ;;  %v2445_v16 = vmov 3   ;;  %v109_v17 = vld [vmem:[#allocation2 + $0x20] sm:$0xff]  ;;  %v110_v18 = vld [vmem:[#allocation2 + $0x28] sm:$0xff] }
  0x28   :  { %2070 = vmatprep.subr.bf16.mxu0 %v2443_v5  ;;  %2214 = vmatprep.subr.bf16.mxu1 %v2443_v5  ;;  %v2521_v14 = vsub.f32 %v106_v4, %v132_v7  ;;  %v141_v20 = vand.u32 4294901760, %v109_v17  ;;  %v144_v21 = vand.u32 4294901760, %v110_v18  ;;  %v111_v24 = vld [vmem:[#allocation2 + $0x30] sm:$0xff]  ;;  %v112_v25 = vld [vmem:[#allocation2 + $0x38] sm:$0xff]  ;;  %v113_v29 = vld [vmem:[#allocation2 + $0x40] sm:$0xff]  ;;  %vm2446_vm0 = vmmov 0  }
  0x29   :  { %v2517_v12 = vpack.c.bf16 %v132_v7, %v129_v6  ;;  %v2519_v13 = vsub.f32 %v105_v3, %v129_v6  ;;  %v2524_v19 = vpack.c.bf16 %v138_v11, %v135_v10  ;;  %v2527_v22 = vsub.f32 %v107_v8, %v135_v10  ;;  %v114_v30 = vld [vmem:[#allocation2 + $0x48] sm:$0xff]  ;;  %v115_v34 = vld [vmem:[#allocation2 + $0x50] sm:$0xff]  ;;  %v116_v35 = vld [vmem:[#allocation2 + $0x58] sm:$0xff] }
  0x2a   :  { %v2529_v23 = vsub.f32 %v108_v9, %v138_v11  ;;  %v2532_v26 = vpack.c.bf16 %v144_v21, %v141_v20  ;;  %v147_v27 = vand.u32 4294901760, %v111_v24  ;;  %v150_v28 = vand.u32 4294901760, %v112_v25  ;;  %v117_v39 = vld [vmem:[#allocation2 + $0x60] sm:$0xff]  ;;  %v118_v40 = vld [vmem:[#allocation2 + $0x68] sm:$0xff]  ;;  %v119_v48 = vld [vmem:[#allocation2 + $0x70] sm:$0xff] }
  0x2b   :  { %2381 = vset.pattern.permute.xlu0 %v2444_v15  ;;  %2383 = vset.pattern.permute.xlu1 %v2445_v16  ;;  %v153_v32 = vand.u32 4294901760, %v113_v29  ;;  %v156_v33 = vand.u32 4294901760, %v114_v30  ;;  %v159_v37 = vand.u32 4294901760, %v115_v34  ;;  %v162_v38 = vand.u32 4294901760, %v116_v35  ;;  %v120_v49 = vld [vmem:[#allocation2 + $0x78] sm:$0xff] }
  0x2c   :  { %75 = vperm.xlu0 %2381, %v54_v2   ;;  %95 = vperm.xlu1 %2383, %v54_v2   ;;  %v2536_v31 = vpack.c.bf16 %v150_v28, %v147_v27  ;;  %v165_v42 = vand.u32 4294901760, %v117_v39  ;;  %v168_v43 = vand.u32 4294901760, %v118_v40  ;;  %v2547_v44 = vsub.f32 %v109_v17, %v141_v20 }
  0x2d   :  { %2072 = vmatpush3.bf16.msra.mxu0 %v2517_v12  ;;  %v2540_v36 = vpack.c.bf16 %v156_v33, %v153_v32  ;;  %v2544_v41 = vpack.c.bf16 %v162_v38, %v159_v37  ;;  %v2549_v45 = vsub.f32 %v110_v18, %v144_v21  ;;  %v2551_v46 = vsub.f32 %v111_v24, %v147_v27 }
  0x2e   :  { %2073 = vmatprep.subr.bf16.mxu0 %v2443_v5  ;;  %v2553_v47 = vsub.f32 %v112_v25, %v150_v28  ;;  %v2555_v50 = vsub.f32 %v113_v29, %v153_v32  ;;  %v2557_v51 = vsub.f32 %v114_v30, %v156_v33  ;;  %v2559_v52 = vsub.f32 %v115_v34, %v159_v37 }
  0x2f   :  { %v2561_v53 = vsub.f32 %v116_v35, %v162_v38  ;;  %v2564_v54 = vpack.c.bf16 %v168_v43, %v165_v42  ;;  %v2566_v55 = vsub.f32 %v117_v39, %v165_v42  ;;  %v2568_v56 = vsub.f32 %v118_v40, %v168_v43 }
  0x30   :  { %2384 = vset.pattern.permute.xlu0 %v2445_v16  ;;  %v171_v57 = vand.u32 4294901760, %v119_v48  ;;  %v174_v58 = vand.u32 4294901760, %v120_v49  ;;  %v3107_v59 = vand.u32 4294901760, %v2519_v13  ;;  %v2447_v61 = vmov 0.0  }
  0x31   :  { %2075 = vmatpush3.bf16.msra.mxu0 %v2524_v19  ;;  %1682 = vmatprep.mubr.msk.f32.mxu0 %vm2446_vm0, %v2447_v61  ;;  %v3106_v62 = vand.u32 4294901760, %v2521_v14  ;;  %v3105_v4 = vand.u32 4294901760, %v2527_v22  ;;  %v3104_v6 = vand.u32 4294901760, %v2529_v23  ;;  %v3103_v16 = vand.u32 4294901760, %v2547_v44 }
  0x32   :  { %2076 = vmatprep.subr.bf16.mxu0 %v2443_v5  ;;  %v2572_v60 = vsub.f32 %v119_v48, %v171_v57  ;;  %1892 = vmatprep.mubr.msk.f32.mxu1 %vm2446_vm0, %v2447_v61  ;;  %v2579_v63 = vsub.f32 %v120_v49, %v174_v58  ;;  %v223_v0 = vsub.f32 %v2519_v13, %v3107_v59  ;;  %v3102_v17 = vand.u32 4294901760, %v2549_v45 }
  0x33   :  { %v2585_v1 = vpack.c.bf16 %v174_v58, %v171_v57  ;;  %v230_v2 = vsub.f32 %v2521_v14, %v3106_v62  ;;  %v237_v8 = vsub.f32 %v2527_v22, %v3105_v4  ;;  %v244_v9 = vsub.f32 %v2529_v23, %v3104_v6 }
  0x34   :  { %v224_v3 = vand.u32 4294901760, %v223_v0  ;;  %v251_v20 = vsub.f32 %v2547_v44, %v3103_v16  ;;  %v258_v21 = vsub.f32 %v2549_v45, %v3102_v17  ;;  %v3101_v27 = vand.u32 4294901760, %v2551_v46 }
  0x35   :  { %2078 = vmatpush3.bf16.msra.mxu0 %v2532_v26  ;;  %v231_v7 = vand.u32 4294901760, %v230_v2  ;;  %v238_v11 = vand.u32 4294901760, %v237_v8  ;;  %v245_v15 = vand.u32 4294901760, %v244_v9  ;;  %v3100_v28 = vand.u32 4294901760, %v2553_v47 }
  0x36   :  { %2079 = vmatprep.subr.bf16.mxu0 %v2443_v5  ;;  %v252_v24 = vand.u32 4294901760, %v251_v20  ;;  %v259_v25 = vand.u32 4294901760, %v258_v21  ;;  %v265_v30 = vsub.f32 %v2551_v46, %v3101_v27  ;;  %v3099_v35 = vand.u32 4294901760, %v2555_v50 }
  0x37   :  { %v2600_v10 = vpack.c.bf16 %v231_v7, %v224_v3  ;;  %v2605_v18 = vpack.c.bf16 %v245_v15, %v238_v11  ;;  %v272_v32 = vsub.f32 %v2553_v47, %v3100_v28  ;;  %v3098_v37 = vand.u32 4294901760, %v2557_v51 }
  0x38   :  { %v2615_v29 = vpack.c.bf16 %v259_v25, %v252_v24  ;;  %v266_v33 = vand.u32 4294901760, %v265_v30  ;;  %v279_v39 = vsub.f32 %v2555_v50, %v3099_v35  ;;  %v3097_v48 = vand.u32 4294901760, %v2559_v52 }
  0x39   :  { %2081 = vmatpush3.bf16.msra.mxu0 %v2536_v31  ;;  %v273_v34 = vand.u32 4294901760, %v272_v32  ;;  %v286_v40 = vsub.f32 %v2557_v51, %v3098_v37  ;;  %v3096_v49 = vand.u32 4294901760, %v2561_v53  ;;  %v3095_v7 = vand.u32 4294901760, %v2566_v55  ;;  %v1443_v37 = vld [vmem:[%s3086_s2] ss:$0 sm:$0xff] }
  0x3a   :  { %2082 = vmatprep.subr.bf16.mxu0 %v2443_v5  ;;  %v280_v42 = vand.u32 4294901760, %v279_v39  ;;  %v293_v58 = vsub.f32 %v2559_v52, %v3097_v48  ;;  %v3094_v8 = vand.u32 4294901760, %v2568_v56  ;;  %v3093_v24 = vand.u32 4294901760, %v2572_v60 }
  0x3b   :  { %v2625_v38 = vpack.c.bf16 %v273_v34, %v266_v33  ;;  %v287_v43 = vand.u32 4294901760, %v286_v40  ;;  %v300_v0 = vsub.f32 %v2561_v53, %v3096_v49  ;;  %v307_v11 = vsub.f32 %v2566_v55, %v3095_v7 }
  0x3c   :  { %v294_v2 = vand.u32 4294901760, %v293_v58  ;;  %v314_v15 = vsub.f32 %v2568_v56, %v3094_v8  ;;  %v3092_v25 = vand.u32 4294901760, %v2579_v63  ;;  %v321_v32 = vsub.f32 %v2572_v60, %v3093_v24 }
  0x3d   :  { %2084 = vmatpush3.bf16.msra.mxu0 %v2540_v36  ;;  %v2635_v57 = vpack.c.bf16 %v287_v43, %v280_v42  ;;  %v301_v3 = vand.u32 4294901760, %v300_v0  ;;  %v308_v20 = vand.u32 4294901760, %v307_v11  ;;  %v2119_v42 = vpack.c.bf16 %v2521_v14, %v2519_v13 }
  0x3e   :  { %2085 = vmatprep.subr.bf16.mxu0 %v2443_v5  ;;  %v315_v21 = vand.u32 4294901760, %v314_v15  ;;  %v328_v33 = vsub.f32 %v2579_v63, %v3092_v25  ;;  %v322_v34 = vand.u32 4294901760, %v321_v32  ;;  %v2122_v43 = vpack.c.bf16 %v2529_v23, %v2527_v22 }
  0x3f   :  { %v2645_v9 = vpack.c.bf16 %v301_v3, %v294_v2  ;;  %v2125_v58 = vpack.c.bf16 %v2549_v45, %v2547_v44  ;;  %v2128_v0 = vpack.c.bf16 %v2553_v47, %v2551_v46  ;;  %v2131_v2 = vpack.c.bf16 %v2557_v51, %v2555_v50 }
  0x40   :  { %v2113_v30 = vpack.c.bf16 %v315_v21, %v308_v20  ;;  %v329_v39 = vand.u32 4294901760, %v328_v33  ;;  %v2134_v3 = vpack.c.bf16 %v2561_v53, %v2559_v52  ;;  %v2137_v11 = vpack.c.bf16 %v2568_v56, %v2566_v55  ;;  %v55_v33 = vld [vmem:[%s3085_s1] sm:$0xf] }
  0x41   :  { %2087 = vmatpush3.bf16.msra.mxu0 %v2544_v41  ;;  %v62_v20 = vlaneseq  ;;  %vm1435_vm1 = vcmask 64512  }
  0x42   :  { %2088 = vmatprep.subr.bf16.mxu0 %v2443_v5  ;;  %v2116_v40 = vpack.c.bf16 %v329_v39, %v322_v34 }
  0x43   :  { %v63_v21 = vshrl.u32 %v62_v20, 7 }
  0x45   :  { %2090 = vmatpush3.bf16.msra.mxu0 %v2564_v54  ;;  %v64_v32 = vsub.s32 0, %v63_v21  ;;  %v80_v39 = vsub.s32 1, %v63_v21  ;;  %v90_v24 = vsub.s32 2, %v63_v21  ;;  %v100_v7 = vsub.s32 3, %v63_v21 }
  0x46   :  { %2091 = vmatprep.subr.bf16.mxu0 %v2443_v5 }
  0x47   :  { %v65_v34 = vrot.slane %v55_v33, %v64_v32  ;;  %v81_v48 = vrot.slane %v55_v33, %v80_v39  ;;  %v91_v35 = vrot.slane %v55_v33, %v90_v24  ;;  %v101_v28 = vrot.slane %v55_v33, %v100_v7  ;;  %v780_v39 = vld [vmem:[#allocation4 + $0x50] sm:$0xff] }
  0x48   :  { %v3115_v24 = vand.u32 4294901760, %v2527_v22  ;;  %v3120_v22 = vand.u32 4294901760, %v2553_v47  ;;  %v3126_v47 = vand.u32 4294901760, %v2568_v56  ;;  %v778_v56 = vld [vmem:[#allocation4 + $0x40] sm:$0xff] }
  0x49   :  { %2093 = vmatpush3.bf16.msra.mxu0 %v2585_v1 }
  0x4a   :  { %2094 = vmatprep.subr.bf16.mxu0 %v2443_v5 }
  0xa6   :  { %v60_v25 = vpop.permute.xlu0 %59  ;;  %v86_v8 = vpop.permute.xlu1 %85 }
  0xa7   :  { %v66_v49 = vmul.f32 %v65_v34, %v60_v25  ;;  %v92_v6 = vmul.f32 %v91_v35, %v86_v8  ;;  %v3114_v8 = vand.u32 4294901760, %v2521_v14  ;;  %v3118_v14 = vand.u32 4294901760, %v2549_v45 }
  0xa8   :  { %v3124_v45 = vand.u32 4294901760, %v2561_v53  ;;  %v777_v53 = vld [vmem:[#allocation4 + $0x38] sm:$0xff] }
  0xa9   :  { %v73_v17 = vadd.f32 %v1443_v37, %v66_v49  ;;  %v3112_v49 = vpack.c.bf16 %v2579_v63, %v2572_v60 }
  0xab   :  { %v76_v20 = vpop.permute.xlu0 %75  ;;  %v96_v27 = vpop.permute.xlu1 %95 }
  0xac   :  { %v82_v16 = vmul.f32 %v81_v48, %v76_v20  ;;  %v102_v32 = vmul.f32 %v101_v28, %v96_v27  ;;  %v781_v20 = vld [vmem:[#allocation4 + $0x58] sm:$0xff] }
  0xae   :  { %v83_v4 = vadd.f32 %v82_v16, %v73_v17  ;;  %v773_v16 = vld [vmem:[#allocation4 + $0x18] sm:$0xff] }
  0xb0   :  { %v93_v62 = vadd.f32 %v92_v6, %v83_v4  ;;  %v772_v4 = vld [vmem:[#allocation4 + $0x10] sm:$0xff] }
  0xb1   :  { %v793_v17 = vand.u32 4294901760, %v772_v4 }
  0xb2   :  { %v103_v59 = vadd.f32 %v102_v32, %v93_v62  ;;  %v771_v62 = vld [vmem:[#allocation4 + $0x8] sm:$0xff]  ;;  %v817_v32 = vand.u32 4294901760, %v780_v39 }
  0xb3   :  { %v2718_v35 = vsub.f32 %v772_v4, %v793_v17 }
  0xb4   :  { %2385 = vtanh.f32 %v103_v59  ;;  %v770_v59 = vld [vmem:[#allocation4] sm:$0xff] }
  0xb5   :  { %v787_v6 = vand.u32 4294901760, %v770_v59 }
  0xb7   :  { %v2714_v28 = vsub.f32 %v770_v59, %v787_v6 }
  0xbe   :  { %v2386_v15 = vpop.eup %2385 }
  0xbf   :  { %v2683_v21 = vand.u32 4294901760, %v2386_v15 }
  0xc1   :  { %v2686_v25 = vsub.f32 %v2386_v15, %v2683_v21 }
  0xc3   :  { %v211_v34 = vand.u32 4294901760, %v2686_v25 }
  0xc5   :  { %v212_v7 = vsub.f32 %v2686_v25, %v211_v34 }
  0xc7   :  { %v213_v37 = vand.u32 4294901760, %v212_v7  ;;  %v783_v7 = vld [vmem:[#allocation4 + $0x68] sm:$0xff] }
  0xc8   :  { %v826_v59 = vand.u32 4294901760, %v783_v7 }
  0xc9   :  { %1683 = vmatmul.mubr.f32.vlgmr.msra.gmra.mrb[0].mxu0 %v213_v37 }
  0xca   :  { %2096 = vmatpush3.bf16.msra.mxu0 %v2600_v10  ;;  %1717 = vmatprep.mubr.msk.f32.mxu0 %vm2446_vm0, %v2447_v61  ;;  %v790_v10 = vand.u32 4294901760, %v771_v62 }
  0xcb   :  { %2097 = vmatprep.subr.bf16.mxu0 %v2443_v5 }
  0xcc   :  { %v2712_v27 = vpack.c.bf16 %v790_v10, %v787_v6 }
  0xce   :  { %2099 = vmatpush3.bf16.msra.mxu0 %v2605_v18  ;;  %v796_v18 = vand.u32 4294901760, %v773_v16  ;;  %2216 = vmatpush3.bf16.msra.mxu1 %v2712_v27 }
  0xcf   :  { %2100 = vmatprep.subr.bf16.mxu0 %v2443_v5  ;;  %2217 = vmatprep.subr.bf16.mxu1 %v2443_v5 }
  0xd0   :  { %v2726_v48 = vpack.c.bf16 %v796_v18, %v793_v17  ;;  %v785_v17 = vld [vmem:[#allocation4 + $0x78] sm:$0xff] }
  0xd2   :  { %2102 = vmatpush3.bf16.msra.mxu0 %v2615_v29  ;;  %v2716_v29 = vsub.f32 %v771_v62, %v790_v10  ;;  %2219 = vmatpush3.bf16.msra.mxu1 %v2726_v48 }
  0xd3   :  { %2103 = vmatprep.subr.bf16.mxu0 %v2443_v5  ;;  %2220 = vmatprep.subr.bf16.mxu1 %v2443_v5 }
  0xd6   :  { %2105 = vmatpush3.bf16.msra.mxu0 %v2625_v38  ;;  %v2720_v38 = vsub.f32 %v773_v16, %v796_v18  ;;  %v784_v16 = vld [vmem:[#allocation4 + $0x70] sm:$0xff] }
  0xd7   :  { %2106 = vmatprep.subr.bf16.mxu0 %v2443_v5 }
  0xda   :  { %2108 = vmatpush3.bf16.msra.mxu0 %v2635_v57  ;;  %v3113_v57 = vand.u32 4294901760, %v2519_v13  ;;  %v3117_v13 = vand.u32 4294901760, %v2547_v44  ;;  %v3123_v44 = vand.u32 4294901760, %v2559_v52 }
  0xdb   :  { %2109 = vmatprep.subr.bf16.mxu0 %v2443_v5 }
  0xde   :  { %2111 = vmatpush3.bf16.msra.mxu0 %v2645_v9  ;;  %v2167_v9 = vpack.c.bf16 %v3114_v8, %v3113_v57  ;;  %v2866_v57 = vsub.f32 %v780_v39, %v817_v32 }
  0xdf   :  { %2112 = vmatprep.subr.bf16.mxu0 %v2443_v5 }
  0xe2   :  { %2114 = vmatpush3.bf16.msra.mxu0 %v2113_v30  ;;  %v3116_v30 = vand.u32 4294901760, %v2529_v23 }
  0xe3   :  { %2115 = vmatprep.subr.bf16.mxu0 %v2443_v5 }
  0xe6   :  { %2117 = vmatpush3.bf16.msra.mxu0 %v2116_v40  ;;  %v2170_v40 = vpack.c.bf16 %v3116_v30, %v3115_v24  ;;  %v2874_v30 = vsub.f32 %v783_v7, %v826_v59 }
  0xe7   :  { %2118 = vmatprep.subr.bf16.mxu0 %v2443_v5 }
  0xe9   :  { %1718 = vmatmul.mubr.f32.vlgmr.msra.gmra.mrb[0].mxu0 %v2683_v21 }
  0xea   :  { %2120 = vmatpush3.bf16.msra.mxu0 %v2119_v42  ;;  %1752 = vmatprep.mubr.msk.f32.mxu0 %vm2446_vm0, %v2447_v61  ;;  %v2173_v42 = vpack.c.bf16 %v3118_v14, %v3117_v13  ;;  %v832_v13 = vand.u32 4294901760, %v785_v17  ;;  %v880_v14 = vand.u32 4294901760, %v2714_v28 }
  0xeb   :  { %2121 = vmatprep.subr.bf16.mxu0 %v2443_v5 }
  0xee   :  { %2123 = vmatpush3.bf16.msra.mxu0 %v2122_v43  ;;  %v3119_v43 = vand.u32 4294901760, %v2551_v46  ;;  %v3125_v46 = vand.u32 4294901760, %v2566_v55  ;;  %v808_v55 = vand.u32 4294901760, %v777_v53 }
  0xef   :  { %2124 = vmatprep.subr.bf16.mxu0 %v2443_v5 }
  0xf0   :  { %v2176_v23 = vpack.c.bf16 %v3120_v22, %v3119_v43  ;;  %v2860_v10 = vsub.f32 %v777_v53, %v808_v55 }
  0xf2   :  { %2126 = vmatpush3.bf16.msra.mxu0 %v2125_v58  ;;  %v3121_v58 = vand.u32 4294901760, %v2555_v50  ;;  %v3127_v50 = vand.u32 4294901760, %v2572_v60  ;;  %v779_v60 = vld [vmem:[#allocation4 + $0x48] sm:$0xff] }
  0xf3   :  { %2127 = vmatprep.subr.bf16.mxu0 %v2443_v5 }
  0xf6   :  { %2129 = vmatpush3.bf16.msra.mxu0 %v2128_v0  ;;  %v3122_v0 = vand.u32 4294901760, %v2557_v51  ;;  %v3128_v51 = vand.u32 4294901760, %v2579_v63  ;;  %v811_v63 = vand.u32 4294901760, %v778_v56 }
  0xf7   :  { %2130 = vmatprep.subr.bf16.mxu0 %v2443_v5 }
  0xf8   :  { %v2188_v15 = vpack.c.bf16 %v3128_v51, %v3127_v50  ;;  %v2862_v18 = vsub.f32 %v778_v56, %v811_v63 }
  0xfa   :  { %2132 = vmatpush3.bf16.msra.mxu0 %v2131_v2  ;;  %v2179_v2 = vpack.c.bf16 %v3122_v0, %v3121_v58  ;;  %v881_v58 = vsub.f32 %v2714_v28, %v880_v14 }
  0xfb   :  { %2133 = vmatprep.subr.bf16.mxu0 %v2443_v5 }
  0xfe   :  { %2135 = vmatpush3.bf16.msra.mxu0 %v2134_v3  ;;  %v2182_v3 = vpack.c.bf16 %v3124_v45, %v3123_v44  ;;  %v894_v45 = vand.u32 4294901760, %v2718_v35 }
  0xff   :  { %2136 = vmatprep.subr.bf16.mxu0 %v2443_v5 }
 0x102   :  { %2138 = vmatpush3.bf16.msra.mxu0 %v2137_v11  ;;  %v2185_v11 = vpack.c.bf16 %v3126_v47, %v3125_v46  ;;  %v895_v47 = vsub.f32 %v2718_v35, %v894_v45 }
 0x103   :  { %2139 = vmatprep.subr.bf16.mxu0 %v2443_v5 }
 0x104   :  { %v896_v50 = vand.u32 4294901760, %v895_v47  ;;  %v3110_v47 = vand.u32 4294901760, %v2874_v30 }
 0x106   :  { %2141 = vmatpush3.bf16.msra.mxu0 %v3112_v49 }
 0x107   :  { %2142 = vmatprep.subr.bf16.mxu0 %v2443_v5 }
 0x109   :  { %1753 = vmatmul.mubr.f32.vlgmr.msra.gmra.mrb[0].mxu0 %v2686_v25 }
 0x10a   :  { %2144 = vmatpush3.bf16.msra.mxu0 %v2517_v12  ;;  %1787 = vmatprep.mubr.msk.f32.mxu0 %vm2446_vm0, %v2447_v61 }
 0x10b   :  { %2145 = vmatprep.subr.bf16.mxu0 %v2443_v5 }
 0x10e   :  { %2147 = vmatpush3.bf16.msra.mxu0 %v2524_v19 }
 0x10f   :  { %2148 = vmatprep.subr.bf16.mxu0 %v2443_v5 }
 0x112   :  { %2150 = vmatpush3.bf16.msra.mxu0 %v2532_v26 }
 0x113   :  { %2151 = vmatprep.subr.bf16.mxu0 %v2443_v5 }
 0x116   :  { %2153 = vmatpush3.bf16.msra.mxu0 %v2536_v31 }
 0x117   :  { %2154 = vmatprep.subr.bf16.mxu0 %v2443_v5 }
 0x11a   :  { %2156 = vmatpush3.bf16.msra.mxu0 %v2540_v36 }
 0x11b   :  { %2157 = vmatprep.subr.bf16.mxu0 %v2443_v5 }
 0x11e   :  { %2159 = vmatpush3.bf16.msra.mxu0 %v2544_v41 }
 0x11f   :  { %2160 = vmatprep.subr.bf16.mxu0 %v2443_v5 }
 0x122   :  { %2162 = vmatpush3.bf16.msra.mxu0 %v2564_v54 }
 0x123   :  { %2163 = vmatprep.subr.bf16.mxu0 %v2443_v5 }
 0x126   :  { %2165 = vmatpush3.bf16.msra.mxu0 %v2585_v1 }
 0x127   :  { %2166 = vmatprep.subr.bf16.mxu0 %v2443_v5 }
 0x129   :  { %1788 = vmatmul.mubr.f32.vlgmr.msra.gmra.mrb[0].mxu0 %v211_v34  ;;  %v782_v34 = vld [vmem:[#allocation4 + $0x60] sm:$0xff] }
 0x12a   :  { %2168 = vmatpush3.bf16.msra.mxu0 %v2167_v9  ;;  %1822 = vmatprep.mubr.msk.f32.mxu0 %vm2446_vm0, %v2447_v61  ;;  %v823_v37 = vand.u32 4294901760, %v782_v34 }
 0x12b   :  { %2169 = vmatprep.subr.bf16.mxu0 %v2443_v5 }
 0x12c   :  { %v2870_v9 = vpack.c.bf16 %v826_v59, %v823_v37  ;;  %v2872_v24 = vsub.f32 %v782_v34, %v823_v37 }
 0x12e   :  { %2171 = vmatpush3.bf16.msra.mxu0 %v2170_v40  ;;  %v829_v40 = vand.u32 4294901760, %v784_v16 }
 0x12f   :  { %2172 = vmatprep.subr.bf16.mxu0 %v2443_v5 }
 0x130   :  { %v2879_v43 = vsub.f32 %v784_v16, %v829_v40  ;;  %v2882_v22 = vpack.c.bf16 %v832_v13, %v829_v40  ;;  %v950_v16 = vand.u32 4294901760, %v2866_v57 }
 0x132   :  { %2174 = vmatpush3.bf16.msra.mxu0 %v2173_v42  ;;  %v887_v42 = vand.u32 4294901760, %v2716_v29 }
 0x133   :  { %2175 = vmatprep.subr.bf16.mxu0 %v2443_v5 }
 0x134   :  { %v888_v0 = vsub.f32 %v2716_v29, %v887_v42 }
 0x136   :  { %2177 = vmatpush3.bf16.msra.mxu0 %v2176_v23  ;;  %v2884_v23 = vsub.f32 %v785_v17, %v832_v13  ;;  %v889_v44 = vand.u32 4294901760, %v888_v0  ;;  %v951_v13 = vsub.f32 %v2866_v57, %v950_v16 }
 0x137   :  { %2178 = vmatprep.subr.bf16.mxu0 %v2443_v5 }
 0x138   :  { %v952_v0 = vand.u32 4294901760, %v951_v13 }
 0x13a   :  { %2180 = vmatpush3.bf16.msra.mxu0 %v2179_v2  ;;  %v882_v2 = vand.u32 4294901760, %v881_v58 }
 0x13b   :  { %2181 = vmatprep.subr.bf16.mxu0 %v2443_v5 }
 0x13c   :  { %v2896_v46 = vpack.c.bf16 %v889_v44, %v882_v2  ;;  %v3111_v44 = vand.u32 4294901760, %v2872_v24 }
 0x13e   :  { %2183 = vmatpush3.bf16.msra.mxu0 %v2182_v3  ;;  %v901_v3 = vand.u32 4294901760, %v2720_v38 }
 0x13f   :  { %2184 = vmatprep.subr.bf16.mxu0 %v2443_v5 }
 0x142   :  { %2186 = vmatpush3.bf16.msra.mxu0 %v2185_v11  ;;  %v902_v11 = vsub.f32 %v2720_v38, %v901_v3 }
 0x143   :  { %2187 = vmatprep.subr.bf16.mxu0 %v2443_v5 }
 0x144   :  { %v903_v51 = vand.u32 4294901760, %v902_v11 }
 0x146   :  { %2189 = vmatpush3.bf16.msra.mxu0 %v2188_v15 }
 0x147   :  { %2190 = vmatprep.subr.bf16.mxu0 %v2443_v5 }
 0x149   :  { %1823 = vmatmul.mubr.f32.vlgmr.msra.gmra.mrb[0].mxu0 %v2683_v21 }
 0x14a   :  { %2192 = vmatpush3.bf16.msra.mxu0 %v2517_v12  ;;  %1857 = vmatprep.mubr.msk.f32.mxu0 %vm2446_vm0, %v2447_v61  ;;  %v774_v12 = vld [vmem:[#allocation4 + $0x20] sm:$0xff] }
 0x14b   :  { %2193 = vmatprep.subr.bf16.mxu0 %v2443_v5 }
 0x14e   :  { %2195 = vmatpush3.bf16.msra.mxu0 %v2524_v19  ;;  %v775_v19 = vld [vmem:[#allocation4 + $0x28] sm:$0xff] }
 0x14f   :  { %2196 = vmatprep.subr.bf16.mxu0 %v2443_v5 }
 0x152   :  { %2198 = vmatpush3.bf16.msra.mxu0 %v2532_v26  ;;  %v799_v26 = vand.u32 4294901760, %v774_v12 }
 0x153   :  { %2199 = vmatprep.subr.bf16.mxu0 %v2443_v5 }
 0x154   :  { %v2854_v62 = vsub.f32 %v774_v12, %v799_v26 }
 0x156   :  { %2201 = vmatpush3.bf16.msra.mxu0 %v2536_v31  ;;  %v802_v31 = vand.u32 4294901760, %v775_v19  ;;  %v908_v15 = vand.u32 4294901760, %v2854_v62 }
 0x157   :  { %2202 = vmatprep.subr.bf16.mxu0 %v2443_v5 }
 0x158   :  { %v2838_v52 = vpack.c.bf16 %v802_v31, %v799_v26  ;;  %v2856_v4 = vsub.f32 %v775_v19, %v802_v31  ;;  %v2906_v19 = vpack.c.bf16 %v903_v51, %v896_v50  ;;  %v909_v26 = vsub.f32 %v2854_v62, %v908_v15 }
 0x159   :  { %v965_v50 = vsub.f32 %v2872_v24, %v3111_v44  ;;  %v972_v51 = vsub.f32 %v2874_v30, %v3110_v47 }
 0x15a   :  { %2204 = vmatpush3.bf16.msra.mxu0 %v2540_v36  ;;  %v776_v36 = vld [vmem:[#allocation4 + $0x30] sm:$0xff]  ;;  %2222 = vmatpush3.bf16.msra.mxu1 %v2838_v52  ;;  %v915_v12 = vand.u32 4294901760, %v2856_v4  ;;  %v2269_v13 = vpack.c.bf16 %v2856_v4, %v2854_v62  ;;  %v3129_v62 = vand.u32 4294901760, %v2872_v24 }
 0x15b   :  { %2205 = vmatprep.subr.bf16.mxu0 %v2443_v5  ;;  %2223 = vmatprep.subr.bf16.mxu1 %v2443_v5 }
 0x15c   :  { %v916_v31 = vsub.f32 %v2856_v4, %v915_v12  ;;  %v3130_v4 = vand.u32 4294901760, %v2874_v30 }
 0x15e   :  { %2207 = vmatpush3.bf16.msra.mxu0 %v2544_v41  ;;  %v805_v41 = vand.u32 4294901760, %v776_v36  ;;  %v917_v53 = vand.u32 4294901760, %v916_v31  ;;  %v973_v31 = vand.u32 4294901760, %v972_v51  ;;  %v2284_v51 = vpack.c.bf16 %v2884_v23, %v2879_v43 }
 0x15f   :  { %2208 = vmatprep.subr.bf16.mxu0 %v2443_v5 }
 0x160   :  { %v2858_v6 = vsub.f32 %v776_v36, %v805_v41  ;;  %v910_v36 = vand.u32 4294901760, %v909_v26  ;;  %v966_v26 = vand.u32 4294901760, %v965_v50  ;;  %v2281_v50 = vpack.c.bf16 %v2874_v30, %v2872_v24 }
 0x162   :  { %2210 = vmatpush3.bf16.msra.mxu0 %v2564_v54  ;;  %v2842_v54 = vpack.c.bf16 %v808_v55, %v805_v41  ;;  %v922_v41 = vand.u32 4294901760, %v2858_v6  ;;  %v929_v55 = vand.u32 4294901760, %v2860_v10  ;;  %v2245_v56 = vpack.c.bf16 %v917_v53, %v910_v36 }
 0x163   :  { %2211 = vmatprep.subr.bf16.mxu0 %v2443_v5  ;;  %v3109_v36 = vand.u32 4294901760, %v2879_v43  ;;  %v3108_v53 = vand.u32 4294901760, %v2884_v23 }
 0x164   :  { %2225 = vmatpush3.bf16.msra.mxu1 %v2842_v54 }
 0x165   :  { %2226 = vmatprep.subr.bf16.mxu1 %v2443_v5 }
 0x166   :  { %2213 = vmatpush3.bf16.msra.mxu0 %v2585_v1  ;;  %v814_v1 = vand.u32 4294901760, %v779_v60 }
 0x168   :  { %v2846_v33 = vpack.c.bf16 %v814_v1, %v811_v63  ;;  %v2864_v49 = vsub.f32 %v779_v60, %v814_v1  ;;  %v923_v60 = vsub.f32 %v2858_v6, %v922_v41  ;;  %v930_v63 = vsub.f32 %v2860_v10, %v929_v55 }
 0x169   :  { %1858 = vmatmul.mubr.f32.vlgmr.msra.gmra.mrb[0].mxu0 %v2683_v21  ;;  %v820_v21 = vand.u32 4294901760, %v781_v20 }
 0x16a   :  { %2228 = vmatpush3.bf16.msra.mxu1 %v2846_v33  ;;  %v924_v1 = vand.u32 4294901760, %v923_v60  ;;  %v931_v39 = vand.u32 4294901760, %v930_v63  ;;  %v2257_v60 = vpack.c.bf16 %v973_v31, %v966_v26  ;;  %v979_v63 = vsub.f32 %v2879_v43, %v3109_v36  ;;  %v1444_v26 = vld [vmem:[%s3088_s4] ss:$0 sm:$0xff] }
 0x16b   :  { %2229 = vmatprep.subr.bf16.mxu1 %v2443_v5  ;;  %v2850_v25 = vpack.c.bf16 %v820_v21, %v817_v32  ;;  %v2868_v8 = vsub.f32 %v781_v20, %v820_v21  ;;  %v936_v20 = vand.u32 4294901760, %v2862_v18  ;;  %v943_v32 = vand.u32 4294901760, %v2864_v49 }
 0x16c   :  { %v2248_v21 = vpack.c.bf16 %v931_v39, %v924_v1  ;;  %v986_v1 = vsub.f32 %v2884_v23, %v3108_v53  ;;  %v980_v39 = vand.u32 4294901760, %v979_v63 }
 0x16d   :  { %v937_v34 = vsub.f32 %v2862_v18, %v936_v20  ;;  %v944_v7 = vsub.f32 %v2864_v49, %v943_v32  ;;  %v957_v17 = vand.u32 4294901760, %v2868_v8 }
 0x16e   :  { %2231 = vmatpush3.bf16.msra.mxu1 %v2850_v25 }
 0x16f   :  { %2232 = vmatprep.subr.bf16.mxu1 %v2443_v5  ;;  %v938_v37 = vand.u32 4294901760, %v937_v34  ;;  %v945_v59 = vand.u32 4294901760, %v944_v7  ;;  %v958_v58 = vsub.f32 %v2868_v8, %v957_v17  ;;  %v987_v34 = vand.u32 4294901760, %v986_v1 }
 0x171   :  { %v2251_v40 = vpack.c.bf16 %v945_v59, %v938_v37  ;;  %v959_v2 = vand.u32 4294901760, %v958_v58  ;;  %v2260_v7 = vpack.c.bf16 %v987_v34, %v980_v39  ;;  %v2263_v37 = vpack.c.bf16 %v2716_v29, %v2714_v28 }
 0x172   :  { %2234 = vmatpush3.bf16.msra.mxu1 %v2870_v9  ;;  %v2266_v59 = vpack.c.bf16 %v2720_v38, %v2718_v35  ;;  %v2272_v58 = vpack.c.bf16 %v2860_v10, %v2858_v6  ;;  %v2317_v28 = vpack.c.bf16 %v915_v12, %v908_v15  ;;  %v2320_v29 = vpack.c.bf16 %v929_v55, %v922_v41 }
 0x173   :  { %2235 = vmatprep.subr.bf16.mxu1 %v2443_v5  ;;  %v2254_v11 = vpack.c.bf16 %v959_v2, %v952_v0  ;;  %v2275_v0 = vpack.c.bf16 %v2864_v49, %v2862_v18  ;;  %v2278_v2 = vpack.c.bf16 %v2868_v8, %v2866_v57  ;;  %v2323_v35 = vpack.c.bf16 %v943_v32, %v936_v20 }
 0x174   :  { %v2326_v38 = vpack.c.bf16 %v957_v17, %v950_v16  ;;  %v2329_v6 = vpack.c.bf16 %v3130_v4, %v3129_v62  ;;  %v3131_v10 = vand.u32 4294901760, %v2879_v43  ;;  %v3132_v18 = vand.u32 4294901760, %v2884_v23 }
 0x176   :  { %2237 = vmatpush3.bf16.msra.mxu1 %v2882_v22  ;;  %v2332_v49 = vpack.c.bf16 %v3132_v18, %v3131_v10 }
 0x177   :  { %2238 = vmatprep.subr.bf16.mxu1 %v2443_v5 }
 0x23c   :  { %v765_v31 = vpop.f32.mrb[0].mxu0 }
 0x23d   :  { %v2358_v63 = vadd.f32 %v1444_v26, %v765_v31  ;;  %v1859_v1 = vpop.f32.mrb[1].mxu0 }
 0x23f   :  { %2387 = vtanh.f32 %v2358_v63 }
 0x249   :  { %v2388_v39 = vpop.eup %2387 }
 0x24a   :  { %v2973_v34 = vand.u32 4294901760, %v2388_v39 }
 0x24c   :  { %v868_v53 = vsub.f32 %v2388_v39, %v2973_v34 }
 0x24e   :  { %v869_v36 = vand.u32 4294901760, %v868_v53 }
 0x250   :  { %v870_v47 = vsub.f32 %v868_v53, %v869_v36 }
 0x252   :  { %v871_v44 = vand.u32 4294901760, %v870_v47 }
 0x254   :  { %1893 = vmatmul.mubr.f32.vlgmr.msra.gmra.mrb[0].mxu1 %v871_v44 }
 0x255   :  { %2240 = vmatpush3.bf16.msra.mxu1 %v2896_v46  ;;  %1927 = vmatprep.mubr.msk.f32.mxu1 %vm2446_vm0, %v2447_v61  ;;  %v2311_v46 = vpack.c.bf16 %v887_v42, %v880_v14 }
 0x256   :  { %2241 = vmatprep.subr.bf16.mxu1 %v2443_v5 }
 0x259   :  { %2243 = vmatpush3.bf16.msra.mxu1 %v2906_v19  ;;  %v2314_v19 = vpack.c.bf16 %v901_v3, %v894_v45 }
 0x25a   :  { %2244 = vmatprep.subr.bf16.mxu1 %v2443_v5 }
 0x25d   :  { %2246 = vmatpush3.bf16.msra.mxu1 %v2245_v56 }
 0x25e   :  { %2247 = vmatprep.subr.bf16.mxu1 %v2443_v5 }
 0x261   :  { %2249 = vmatpush3.bf16.msra.mxu1 %v2248_v21 }
 0x262   :  { %2250 = vmatprep.subr.bf16.mxu1 %v2443_v5 }
 0x265   :  { %2252 = vmatpush3.bf16.msra.mxu1 %v2251_v40 }
 0x266   :  { %2253 = vmatprep.subr.bf16.mxu1 %v2443_v5 }
 0x269   :  { %2255 = vmatpush3.bf16.msra.mxu1 %v2254_v11 }
 0x26a   :  { %2256 = vmatprep.subr.bf16.mxu1 %v2443_v5 }
 0x26d   :  { %2258 = vmatpush3.bf16.msra.mxu1 %v2257_v60 }
 0x26e   :  { %2259 = vmatprep.subr.bf16.mxu1 %v2443_v5 }
 0x271   :  { %2261 = vmatpush3.bf16.msra.mxu1 %v2260_v7 }
 0x272   :  { %2262 = vmatprep.subr.bf16.mxu1 %v2443_v5 }
 0x274   :  { %1928 = vmatmul.mubr.f32.vlgmr.msra.gmra.mrb[2].mxu1 %v2973_v34 }
 0x275   :  { %2264 = vmatpush3.bf16.msra.mxu1 %v2263_v37  ;;  %1962 = vmatprep.mubr.msk.f32.mxu1 %vm2446_vm0, %v2447_v61 }
 0x276   :  { %2265 = vmatprep.subr.bf16.mxu1 %v2443_v5 }
 0x279   :  { %2267 = vmatpush3.bf16.msra.mxu1 %v2266_v59 }
 0x27a   :  { %2268 = vmatprep.subr.bf16.mxu1 %v2443_v5 }
 0x27d   :  { %2270 = vmatpush3.bf16.msra.mxu1 %v2269_v13 }
 0x27e   :  { %2271 = vmatprep.subr.bf16.mxu1 %v2443_v5 }
 0x281   :  { %2273 = vmatpush3.bf16.msra.mxu1 %v2272_v58 }
 0x282   :  { %2274 = vmatprep.subr.bf16.mxu1 %v2443_v5 }
 0x285   :  { %2276 = vmatpush3.bf16.msra.mxu1 %v2275_v0 }
 0x286   :  { %2277 = vmatprep.subr.bf16.mxu1 %v2443_v5 }
 0x289   :  { %2279 = vmatpush3.bf16.msra.mxu1 %v2278_v2 }
 0x28a   :  { %2280 = vmatprep.subr.bf16.mxu1 %v2443_v5 }
 0x28d   :  { %2282 = vmatpush3.bf16.msra.mxu1 %v2281_v50 }
 0x28e   :  { %2283 = vmatprep.subr.bf16.mxu1 %v2443_v5 }
 0x291   :  { %2285 = vmatpush3.bf16.msra.mxu1 %v2284_v51 }
 0x292   :  { %2286 = vmatprep.subr.bf16.mxu1 %v2443_v5 }
 0x294   :  { %1963 = vmatmul.mubr.f32.vlgmr.msra.gmra.mrb[4].mxu1 %v868_v53 }
 0x295   :  { %2288 = vmatpush3.bf16.msra.mxu1 %v2712_v27  ;;  %1997 = vmatprep.mubr.msk.f32.mxu1 %vm2446_vm0, %v2447_v61 }
 0x296   :  { %2289 = vmatprep.subr.bf16.mxu1 %v2443_v5 }
 0x299   :  { %2291 = vmatpush3.bf16.msra.mxu1 %v2726_v48 }
 0x29a   :  { %2292 = vmatprep.subr.bf16.mxu1 %v2443_v5 }
 0x29d   :  { %2294 = vmatpush3.bf16.msra.mxu1 %v2838_v52 }
 0x29e   :  { %2295 = vmatprep.subr.bf16.mxu1 %v2443_v5 }
 0x2a1   :  { %2297 = vmatpush3.bf16.msra.mxu1 %v2842_v54 }
 0x2a2   :  { %2298 = vmatprep.subr.bf16.mxu1 %v2443_v5 }
 0x2a5   :  { %2300 = vmatpush3.bf16.msra.mxu1 %v2846_v33 }
 0x2a6   :  { %2301 = vmatprep.subr.bf16.mxu1 %v2443_v5 }
 0x2a9   :  { %2303 = vmatpush3.bf16.msra.mxu1 %v2850_v25 }
 0x2aa   :  { %2304 = vmatprep.subr.bf16.mxu1 %v2443_v5 }
 0x2ad   :  { %2306 = vmatpush3.bf16.msra.mxu1 %v2870_v9 }
 0x2ae   :  { %2307 = vmatprep.subr.bf16.mxu1 %v2443_v5 }
 0x2b1   :  { %2309 = vmatpush3.bf16.msra.mxu1 %v2882_v22 }
 0x2b2   :  { %2310 = vmatprep.subr.bf16.mxu1 %v2443_v5 }
 0x2b4   :  { %1998 = vmatmul.mubr.f32.vlgmr.msra.gmra.mrb[6].mxu1 %v869_v36 }
 0x2b5   :  { %2312 = vmatpush3.bf16.msra.mxu1 %v2311_v46  ;;  %2032 = vmatprep.mubr.msk.f32.mxu1 %vm2446_vm0, %v2447_v61 }
 0x2b6   :  { %2313 = vmatprep.subr.bf16.mxu1 %v2443_v5 }
 0x2b9   :  { %2315 = vmatpush3.bf16.msra.mxu1 %v2314_v19 }
 0x2ba   :  { %2316 = vmatprep.subr.bf16.mxu1 %v2443_v5 }
 0x2bd   :  { %2318 = vmatpush3.bf16.msra.mxu1 %v2317_v28 }
 0x2be   :  { %2319 = vmatprep.subr.bf16.mxu1 %v2443_v5 }
 0x2c1   :  { %2321 = vmatpush3.bf16.msra.mxu1 %v2320_v29 }
 0x2c2   :  { %2322 = vmatprep.subr.bf16.mxu1 %v2443_v5 }
 0x2c5   :  { %2324 = vmatpush3.bf16.msra.mxu1 %v2323_v35 }
 0x2c6   :  { %2325 = vmatprep.subr.bf16.mxu1 %v2443_v5 }
 0x2c9   :  { %2327 = vmatpush3.bf16.msra.mxu1 %v2326_v38 }
 0x2ca   :  { %2328 = vmatprep.subr.bf16.mxu1 %v2443_v5 }
 0x2cd   :  { %2330 = vmatpush3.bf16.msra.mxu1 %v2329_v6 }
 0x2ce   :  { %2331 = vmatprep.subr.bf16.mxu1 %v2443_v5 }
 0x2d1   :  { %2333 = vmatpush3.bf16.msra.mxu1 %v2332_v49 }
 0x2d2   :  { %2334 = vmatprep.subr.bf16.mxu1 %v2443_v5 }
 0x2d4   :  { %2033 = vmatmul.mubr.f32.vlgmr.msra.gmra.mrb[8].mxu1 %v2973_v34 }
 0x2d5   :  { %2336 = vmatpush3.bf16.msra.mxu1 %v2712_v27  ;;  %2067 = vmatprep.mubr.msk.f32.mxu1 %vm2446_vm0, %v2447_v61 }
 0x2d6   :  { %2337 = vmatprep.subr.bf16.mxu1 %v2443_v5 }
 0x2d9   :  { %2339 = vmatpush3.bf16.msra.mxu1 %v2726_v48 }
 0x2da   :  { %2340 = vmatprep.subr.bf16.mxu1 %v2443_v5 }
 0x2dd   :  { %2342 = vmatpush3.bf16.msra.mxu1 %v2838_v52 }
 0x2de   :  { %2343 = vmatprep.subr.bf16.mxu1 %v2443_v5 }
 0x2e1   :  { %2345 = vmatpush3.bf16.msra.mxu1 %v2842_v54 }
 0x2e2   :  { %2346 = vmatprep.subr.bf16.mxu1 %v2443_v5 }
 0x2e5   :  { %2348 = vmatpush3.bf16.msra.mxu1 %v2846_v33 }
 0x2e6   :  { %2349 = vmatprep.subr.bf16.mxu1 %v2443_v5 }
 0x2e9   :  { %2351 = vmatpush3.bf16.msra.mxu1 %v2850_v25 }
 0x2ea   :  { %2352 = vmatprep.subr.bf16.mxu1 %v2443_v5 }
 0x2ed   :  { %2354 = vmatpush3.bf16.msra.mxu1 %v2870_v9 }
 0x2ee   :  { %2355 = vmatprep.subr.bf16.mxu1 %v2443_v5  ;;  %v1445_v5 = vld [vmem:[%s3090_s6] ss:$0 sm:$0xff] }
 0x2f1   :  { %2357 = vmatpush3.bf16.msra.mxu1 %v2882_v22 }
 0x2f4   :  { %2068 = vmatmul.mubr.f32.vlgmr.msra.gmra.mrb[10].mxu1 %v2973_v34 }
 0x327   :  { %v873_v61 = vpop.f32.mrb[0].mxu1 }
 0x328   :  { %v1894_v27 = vpop.f32.mrb[1].mxu1 }
 0x347   :  { %v1024_v48 = vpop.f32.mrb[2].mxu1 }
 0x348   :  { %v1025_v52 = vadd.f32 %v1024_v48, %v873_v61  ;;  %v1929_v54 = vpop.f32.mrb[3].mxu1 }
 0x367   :  { %v1128_v33 = vpop.f32.mrb[4].mxu1 }
 0x368   :  { %v1129_v57 = vadd.f32 %v1128_v33, %v1025_v52  ;;  %v1964_v8 = vpop.f32.mrb[5].mxu1 }
 0x387   :  { %v1217_v24 = vpop.f32.mrb[6].mxu1 }
 0x388   :  { %v1218_v25 = vadd.f32 %v1217_v24, %v1129_v57  ;;  %v1999_v30 = vpop.f32.mrb[7].mxu1 }
 0x3a7   :  { %v1336_v14 = vpop.f32.mrb[8].mxu1 }
 0x3a8   :  { %v1337_v42 = vadd.f32 %v1336_v14, %v1218_v25  ;;  %v2034_v9 = vpop.f32.mrb[9].mxu1 }
 0x3c7   :  { %v1423_v43 = vpop.f32.mrb[10].mxu1 }
 0x3c8   :  { %v1424_v22 = vadd.f32 %v1423_v43, %v1337_v42  ;;  %v2069_v23 = vpop.f32.mrb[11].mxu1 }
 0x3ca   :  { %v1434_v45 = vadd.f32 %v1445_v5, %v1424_v22 }
 0x3cc   :  { %1436 = vst.msk [vmem:[%s3091_s7] sm:$0xff] %vm1435_vm1, %v1434_v45 }
 0x3cd   :  { %1441 = vsyncpa [#allocation3], 1 }
 0x3ce   :  { %1442 = vsyncpa [#allocation5], 1 }

</bundles_post_ra>
